<compile_context>
chip_gen: v6e
topology: v6e:2x2x1
jax: 0.10.0
libtpu: 0.0.40
codegen_flags: <defaults>
</compile_context>

<pallas_src>
import functools

import jax
import jax.numpy as jnp
from jax.experimental import pallas as pl
from jax.experimental.pallas import tpu as pltpu


def _canny_conv_kernel(xvf_ref, w_ref, o_ref, *, b, c, h, w):
    """One-shot 3x3 reflection-padded conv.

    xvf_ref: (C, B*(H+2)*W) bf16  -- H-reflection-padded image, row-major flattened
                                      per image: lane = b*(H+2)*W + row*W + col.
    w_ref:   (Cout, 9*C)     bf16  -- weights flattened tap-major: (ky*3 + kx)*C + ci.
    o_ref:   (Cout, B*H*W)   f32   -- lane-dense output slab.
    """
    hw = h * w
    hpw = (h + 2) * w

    # Load once; do all tap assembly in f32 (native VPU path on v5e too).
    xv = xvf_ref[...].astype(jnp.float32)                      # (c, b*hpw)

    # Column index of every output lane (hoisted out of the tap loop).
    x_pos = jax.lax.broadcasted_iota(jnp.int32, (c, b * hw), 1) % w
    at_left = x_pos == 0
    at_right = x_pos == (w - 1)

    taps = []
    for ky in range(3):
        # Vertical tap ky: padded rows [ky, ky+H) of each image are a contiguous
        # lane window of the flattened slab (pure static lane slices + aligned
        # lane concat at the image boundary).
        per_img = [
            xv[:, bi * hpw + ky * w: bi * hpw + ky * w + hw] for bi in range(b)
        ]
        center = jnp.concatenate(per_img, axis=1)              # (c, b*hw), kx = 1
        # Horizontal +/-1 taps via lane shifts.  Wrap-around / cross-row /
        # cross-image leakage only lands on the masked (reflected) positions.
        minus = jnp.roll(center, 1, axis=1)                    # value at column x-1
        plus = jnp.roll(center, -1, axis=1)                    # value at column x+1
        left = jnp.where(at_left, plus, minus)                 # kx = 0 (reflect x==0 -> 1)
        right = jnp.where(at_right, minus, plus)               # kx = 2 (reflect x==W-1 -> W-2)
        taps += [left, center, right]

    # K = 36 LHS built entirely in VMEM; single MXU contraction, f32 accumulate.
    cols = jnp.concatenate(taps, axis=0).astype(jnp.bfloat16)  # (9*c, b*hw)
    o_ref[...] = jnp.dot(
        w_ref[...], cols, preferred_element_type=jnp.float32
    ).astype(o_ref.dtype)


def canny_net_forward(x, weight):
    """x: (B, C, H, W) float32, weight: (Cout, C, 3, 3) float32 -> (B, Cout, H, W)."""
    b, c, h, w = x.shape
    cout = weight.shape[0]
    if h < 2 or w < 2:
        raise ValueError("ReflectionPad2d(1) requires H >= 2 and W >= 2")
    hw = h * w
    hp = h + 2
    # Lane-density note: b*hw = 512 here (multiple of 128 -> unmasked stores).
    # For arbitrary sizes, pad hw up to a multiple of 128 and slice afterwards.

    # Reflection pad in H only; the W-direction taps / reflection are formed
    # in-kernel with lane rolls, so no horizontal pad and no 9x slab in HBM.
    xv = jnp.pad(x, ((0, 0), (0, 0), (1, 1), (0, 0)), mode="reflect")   # (B, C, H+2, W)
    # Channel-major, lane-flattened slab: lane = b*(H+2)*W + row*W + col.
    xvf = xv.transpose(1, 0, 2, 3).reshape(c, b * hp * w).astype(jnp.bfloat16)
    # Weights flattened tap-major: column = (ky*3 + kx)*C + ci (matches cols rows).
    w_flat = weight.transpose(0, 2, 3, 1).reshape(cout, 9 * c).astype(jnp.bfloat16)

    flops = 2 * cout * 9 * c * b * hw
    bytes_accessed = xvf.size * 2 + w_flat.size * 2 + cout * b * hw * 4

    out_flat = pl.pallas_call(
        functools.partial(_canny_conv_kernel, b=b, c=c, h=h, w=w),
        out_shape=jax.ShapeDtypeStruct((cout, b * hw), jnp.float32),
        grid_spec=pltpu.PrefetchScalarGridSpec(
            num_scalar_prefetch=0,
            grid=(1,),  # single step: prologue + weight DMA paid once for the batch
            in_specs=[
                pl.BlockSpec((c, b * hp * w), lambda i: (0, 0)),
                pl.BlockSpec((cout, 9 * c), lambda i: (0, 0)),
            ],
            out_specs=pl.BlockSpec((cout, b * hw), lambda i: (0, 0)),
        ),
        compiler_params=pltpu.CompilerParams(
            dimension_semantics=("arbitrary",),
        ),
        cost_estimate=pl.CostEstimate(
            flops=flops, transcendentals=0, bytes_accessed=bytes_accessed),
    )(xvf, w_flat)

    # (Cout, B*HW) -> (B, Cout, H, W); tiny wrapper-side relabeling.
    return out_flat.reshape(cout, b, h, w).transpose(1, 0, 2, 3).astype(x.dtype)


def _reference_forward(x, weight):
    x_pad = jnp.pad(x, ((0, 0), (0, 0), (1, 1), (1, 1)), mode="reflect")
    return jax.lax.conv_general_dilated(
        x_pad, weight, window_strides=(1, 1), padding="VALID",
        dimension_numbers=("NCHW", "OIHW", "NCHW"),
        precision=jax.lax.Precision.HIGHEST)


if __name__ == "__main__":
    key = jax.random.PRNGKey(0)
    k_x, k_w = jax.random.split(key)

    B, C, H, W = 2, 4, 16, 16
    x = jax.random.normal(k_x, (B, C, H, W), dtype=jnp.float32)

    # Deterministic Conv2d-like init: uniform(-k, k), k = 1/sqrt(fan_in) = 1/sqrt(4*3*3)
    fan_in = C * 3 * 3
    bound = 1.0 / (fan_in ** 0.5)
    weight = jax.random.uniform(k_w, (4, C, 3, 3), dtype=jnp.float32,
                                minval=-bound, maxval=bound)

    fwd = jax.jit(canny_net_forward)
    out = jax.block_until_ready(fwd(x, weight))
    assert out.shape == (B, 4, H, W)

    # Tight check against the quantization-matched reference (inputs rounded to
    # bf16, f32 accumulation) -- same numerics as the kernel's bf16-MXU path.
    x_q = x.astype(jnp.bfloat16).astype(jnp.float32)
    w_q = weight.astype(jnp.bfloat16).astype(jnp.float32)
    ref_q = _reference_forward(x_q, w_q)
    assert jnp.allclose(out, ref_q, atol=1e-3, rtol=1e-3), "mismatch vs bf16-rounded reference"

    # Loose check against the full-precision module semantics (only bf16 input
    # rounding separates the two).
    ref = _reference_forward(x, weight)
    assert jnp.allclose(out, ref, atol=5e-2, rtol=5e-2), "mismatch vs f32 reference conv"

    print("KERNEL_OK")
</pallas_src>

<mosaic_0001>
module attributes {stable_mosaic.version = 11 : i64} {
  func.func @_canny_conv_kernel(%arg0: i32, %arg1: memref<4x576xbf16, #tpu.memory_space<vmem>>, %arg2: memref<4x36xbf16, #tpu.memory_space<vmem>>, %arg3: memref<4x512xf32, #tpu.memory_space<vmem>>) attributes {dimension_semantics = [#tpu.dimension_semantics<arbitrary>], iteration_bounds = array<i64: 1>, scalar_prefetch = 0 : i64, scratch_operands = 0 : i64, tpu.core_type = #tpu.core_type<tc>, window_params = [{pipeline_mode = #tpu.pipeline_mode<synchronous>, transform_indices = @transform_0, window_bounds = array<i64: 4, 576>}, {pipeline_mode = #tpu.pipeline_mode<synchronous>, transform_indices = @transform_1, window_bounds = array<i64: 4, 36>}, {pipeline_mode = #tpu.pipeline_mode<synchronous>, transform_indices = @transform_2, window_bounds = array<i64: 4, 512>}]} {
    %c0 = arith.constant 0 : index
    %c0_0 = arith.constant 0 : index
    %0 = vector.load %arg1[%c0, %c0_0] : memref<4x576xbf16, #tpu.memory_space<vmem>>, vector<4x576xbf16>
    %1 = arith.extf %0 : vector<4x576xbf16> to vector<4x576xf32>
    %2 = tpu.iota {dimensions = array<i32: 1>} : vector<4x512xi32>
    %c16_i32 = arith.constant 16 : i32
    %c0_i32 = arith.constant 0 : i32
    %3 = arith.cmpi eq, %c16_i32, %c0_i32 : i32
    %c1_i32 = arith.constant 1 : i32
    %4 = arith.select %3, %c1_i32, %c16_i32 : i32
    %5 = vector.broadcast %4 : i32 to vector<4x512xi32>
    %6 = arith.remsi %2, %5 : vector<4x512xi32>
    %c0_i32_1 = arith.constant 0 : i32
    %7 = vector.broadcast %c0_i32_1 : i32 to vector<4x512xi32>
    %8 = arith.cmpi ne, %6, %7 : vector<4x512xi32>
    %c0_i32_2 = arith.constant 0 : i32
    %9 = vector.broadcast %c0_i32_2 : i32 to vector<4x512xi32>
    %10 = arith.cmpi slt, %6, %9 : vector<4x512xi32>
    %c0_i32_3 = arith.constant 0 : i32
    %11 = arith.cmpi slt, %4, %c0_i32_3 : i32
    %12 = vector.broadcast %11 : i1 to vector<4x512xi1>
    %13 = vector.broadcast %12 : vector<4x512xi1> to vector<4x512xi1>
    %14 = arith.xori %10, %13 : vector<4x512xi1>
    %15 = arith.andi %14, %8 : vector<4x512xi1>
    %16 = vector.broadcast %4 : i32 to vector<4x512xi32>
    %17 = arith.addi %6, %16 : vector<4x512xi32>
    %18 = arith.select %15, %17, %6 : vector<4x512xi1>, vector<4x512xi32>
    %c0_i32_4 = arith.constant 0 : i32
    %19 = vector.broadcast %c0_i32_4 : i32 to vector<4x512xi32>
    %20 = arith.cmpi eq, %18, %19 : vector<4x512xi32>
    %c15_i32 = arith.constant 15 : i32
    %21 = vector.broadcast %c15_i32 : i32 to vector<4x512xi32>
    %22 = arith.cmpi eq, %18, %21 : vector<4x512xi32>
    %23 = vector.extract_strided_slice %1 {offsets = [0, 0], sizes = [4, 256], strides = [1, 1]} : vector<4x576xf32> to vector<4x256xf32>
    %24 = vector.extract_strided_slice %1 {offsets = [0, 288], sizes = [4, 256], strides = [1, 1]} : vector<4x576xf32> to vector<4x256xf32>
    %25 = tpu.concatenate %23, %24 in 1 : vector<4x256xf32>, vector<4x256xf32> -> vector<4x512xf32>
    %26 = vector.extract_strided_slice %25 {offsets = [0, 511], sizes = [4, 1], strides = [1, 1]} : vector<4x512xf32> to vector<4x1xf32>
    %27 = vector.extract_strided_slice %25 {offsets = [0, 0], sizes = [4, 511], strides = [1, 1]} : vector<4x512xf32> to vector<4x511xf32>
    %28 = tpu.concatenate %26, %27 in 1 : vector<4x1xf32>, vector<4x511xf32> -> vector<4x512xf32>
    %29 = vector.extract_strided_slice %25 {offsets = [0, 1], sizes = [4, 511], strides = [1, 1]} : vector<4x512xf32> to vector<4x511xf32>
    %30 = vector.extract_strided_slice %25 {offsets = [0, 0], sizes = [4, 1], strides = [1, 1]} : vector<4x512xf32> to vector<4x1xf32>
    %31 = tpu.concatenate %29, %30 in 1 : vector<4x511xf32>, vector<4x1xf32> -> vector<4x512xf32>
    %32 = arith.select %20, %31, %28 : vector<4x512xi1>, vector<4x512xf32>
    %33 = arith.select %22, %28, %31 : vector<4x512xi1>, vector<4x512xf32>
    %34 = vector.extract_strided_slice %1 {offsets = [0, 16], sizes = [4, 256], strides = [1, 1]} : vector<4x576xf32> to vector<4x256xf32>
    %35 = vector.extract_strided_slice %1 {offsets = [0, 304], sizes = [4, 256], strides = [1, 1]} : vector<4x576xf32> to vector<4x256xf32>
    %36 = tpu.concatenate %34, %35 in 1 : vector<4x256xf32>, vector<4x256xf32> -> vector<4x512xf32>
    %37 = vector.extract_strided_slice %36 {offsets = [0, 511], sizes = [4, 1], strides = [1, 1]} : vector<4x512xf32> to vector<4x1xf32>
    %38 = vector.extract_strided_slice %36 {offsets = [0, 0], sizes = [4, 511], strides = [1, 1]} : vector<4x512xf32> to vector<4x511xf32>
    %39 = tpu.concatenate %37, %38 in 1 : vector<4x1xf32>, vector<4x511xf32> -> vector<4x512xf32>
    %40 = vector.extract_strided_slice %36 {offsets = [0, 1], sizes = [4, 511], strides = [1, 1]} : vector<4x512xf32> to vector<4x511xf32>
    %41 = vector.extract_strided_slice %36 {offsets = [0, 0], sizes = [4, 1], strides = [1, 1]} : vector<4x512xf32> to vector<4x1xf32>
    %42 = tpu.concatenate %40, %41 in 1 : vector<4x511xf32>, vector<4x1xf32> -> vector<4x512xf32>
    %43 = arith.select %20, %42, %39 : vector<4x512xi1>, vector<4x512xf32>
    %44 = arith.select %22, %39, %42 : vector<4x512xi1>, vector<4x512xf32>
    %45 = vector.extract_strided_slice %1 {offsets = [0, 32], sizes = [4, 256], strides = [1, 1]} : vector<4x576xf32> to vector<4x256xf32>
    %46 = vector.extract_strided_slice %1 {offsets = [0, 320], sizes = [4, 256], strides = [1, 1]} : vector<4x576xf32> to vector<4x256xf32>
    %47 = tpu.concatenate %45, %46 in 1 : vector<4x256xf32>, vector<4x256xf32> -> vector<4x512xf32>
    %48 = vector.extract_strided_slice %47 {offsets = [0, 511], sizes = [4, 1], strides = [1, 1]} : vector<4x512xf32> to vector<4x1xf32>
    %49 = vector.extract_strided_slice %47 {offsets = [0, 0], sizes = [4, 511], strides = [1, 1]} : vector<4x512xf32> to vector<4x511xf32>
    %50 = tpu.concatenate %48, %49 in 1 : vector<4x1xf32>, vector<4x511xf32> -> vector<4x512xf32>
    %51 = vector.extract_strided_slice %47 {offsets = [0, 1], sizes = [4, 511], strides = [1, 1]} : vector<4x512xf32> to vector<4x511xf32>
    %52 = vector.extract_strided_slice %47 {offsets = [0, 0], sizes = [4, 1], strides = [1, 1]} : vector<4x512xf32> to vector<4x1xf32>
    %53 = tpu.concatenate %51, %52 in 1 : vector<4x511xf32>, vector<4x1xf32> -> vector<4x512xf32>
    %54 = arith.select %20, %53, %50 : vector<4x512xi1>, vector<4x512xf32>
    %55 = arith.select %22, %50, %53 : vector<4x512xi1>, vector<4x512xf32>
    %56 = tpu.concatenate %32, %25, %33, %43, %36, %44, %54, %47, %55 in 0 : vector<4x512xf32>, vector<4x512xf32>, vector<4x512xf32>, vector<4x512xf32>, vector<4x512xf32>, vector<4x512xf32>, vector<4x512xf32>, vector<4x512xf32>, vector<4x512xf32> -> vector<36x512xf32>
    %57 = arith.truncf %56 : vector<36x512xf32> to vector<36x512xbf16>
    %c0_5 = arith.constant 0 : index
    %c0_6 = arith.constant 0 : index
    %58 = vector.load %arg2[%c0_5, %c0_6] : memref<4x36xbf16, #tpu.memory_space<vmem>>, vector<4x36xbf16>
    %cst = arith.constant dense<0.000000e+00> : vector<4x512xf32>
    %59 = tpu.matmul %58, %57, %cst {dimension_numbers = #tpu.dot_dimension_numbers<[1], [0], [0], [1], [0, 0, 1, 1], [], []>} : vector<4x36xbf16>, vector<36x512xbf16>, vector<4x512xf32> -> vector<4x512xf32>
    %c0_7 = arith.constant 0 : index
    %c0_8 = arith.constant 0 : index
    %60 = vector.load %arg3[%c0_7, %c0_8] : memref<4x512xf32, #tpu.memory_space<vmem>>, vector<4x512xf32>
    tpu.vector_store %arg3[%c0_7, %c0_8], %59 {strides = array<i32>} : memref<4x512xf32, #tpu.memory_space<vmem>>, vector<4x512xf32>,
    return
  }
  func.func @transform_0(%arg0: i32) -> (i32, i32) {
    %c0_i32 = arith.constant 0 : i32
    %c0_i32_0 = arith.constant 0 : i32
    %c0_i32_1 = arith.constant 0 : i32
    return %c0_i32, %c0_i32_0 : i32, i32
  }
  func.func @transform_1(%arg0: i32) -> (i32, i32) {
    %c0_i32 = arith.constant 0 : i32
    %c0_i32_0 = arith.constant 0 : i32
    %c0_i32_1 = arith.constant 0 : i32
    return %c0_i32, %c0_i32_0 : i32, i32
  }
  func.func @transform_2(%arg0: i32) -> (i32, i32) {
    %c0_i32 = arith.constant 0 : i32
    %c0_i32_0 = arith.constant 0 : i32
    %c0_i32_1 = arith.constant 0 : i32
    return %c0_i32, %c0_i32_0 : i32, i32
  }
}

</mosaic_0001>

<bundles_post_ra>
// kernel: canny_net_forward.1
= control target key start
LH: loop header
LB: loop body
LE: loop exit
PB: predicated region body
PF: predicated region fallthrough
CT: control target
= control target key end

     0   :  { %s536_s13 = smov 64   ;;  %s537_s14 = smov 96   ;;  %vm89_vm0 = vcmask 785408   ;;  %vm212_vm1 = vcmask 523264   ;;  %vm142_vm2 = vcmask 916480   ;;  %vm153_vm3 = vcmask 654336   ;;  %s797_s0 = inlined_call_operand.vmem [shape: bf16[4,576], index: 0, kind: input, shape index: {}]   ;;  %s798_s1 = inlined_call_operand.vmem [shape: bf16[4,36], index: 1, kind: input, shape index: {}]   ;;  %s799_s2 = inlined_call_operand.vmem [shape: f32[4,512], index: 2, kind: output, shape index: {}]  }
   0x1   :  { %v13_v0 = vld [vmem:[%s797_s0 + $0x8] sm:$0x3]  ;;  %v12_v1 = vld [vmem:[%s797_s0] sm:$0xff]  ;;  %s538_s0 = smov 112   ;;  %s539_s15 = smov 80   ;;  %v542_v51 = vmov 0   ;;  %v17_v52 = vlaneseq }
   0x2   :  { %v16_v2 = vunpack.c.l.bf16 %v13_v0  ;;  %v564_v3 = vunpack.c.l.bf16 %v12_v1  ;;  %v15_v4 = vunpack.c.h.bf16 %v12_v1  ;;  %s540_s16 = smov 1   ;;  %s541_s17 = smov 127   ;;  %376 = vmatprep.mubr.bf16.mxu0 %v542_v51  ;;  %417 = vmatprep.mubr.bf16.mxu1 %v542_v51  ;;  %vm101_vm4 = vcmask 7168   ;;  %v326_v51 = vld [vmem:[%s798_s1] sm:$0x3] }
   0x3   :  { %v18_v53 = vand.u32 127, %v17_v52  ;;  %vm118_vm5 = vcmask 1039360   ;;  %vm331_vm13 = vcmask 1041408   ;;  %vm297_vm14 = vcmask 1043456  }
   0x4   :  { %210 = vrot.lane.b32.xlu1 %v16_v2, %s536_s13  ;;  %v451_v5 = vpack.i.bf16 %v564_v3, %v15_v4  ;;  %v82_v6 = vcombine.high %v15_v4, %v15_v4  ;;  %v569_v8 = vcombine.high %v564_v3, %v564_v3 }
   0x5   :  { %v19_v54 = vadd.s32 128, %v18_v53  ;;  %v21_v55 = vadd.s32 384, %v18_v53  ;;  %v20_v56 = vadd.s32 256, %v18_v53  ;;  %v26_v59 = vand.u32 15, %v18_v53 }
   0x6   :  { %452 = vrot.lane.b32.xlu0 %v451_v5, %s537_s14  ;;  %v456_v7 = vpack.i.bf16 %v82_v6, %v15_v4  ;;  %v574_v9 = vpack.i.bf16 %v569_v8, %v564_v3  ;;  %v471_v10 = vpack.i.bf16 %v16_v2, %v82_v6 }
   0x7   :  { %v33_v57 = vand.u32 15, %v19_v54  ;;  %v47_v58 = vand.u32 15, %v21_v55  ;;  %v40_v62 = vand.u32 15, %v20_v56  ;;  %vm652_vm10 = vcmp.eq.s32.totalorder %v26_v59, 0 }
   0x8   :  { %457 = vrot.lane.b32.xlu1 %v456_v7, %s536_s13  ;;  %vm659_vm11 = vcmp.eq.s32.totalorder %v26_v59, 15  ;;  %v257_v59 = vrot.slane %v564_v3, 4 }
   0x9   :  { %vm636_vm6 = vcmp.eq.s32.totalorder %v33_v57, 0  ;;  %vm640_vm7 = vcmp.eq.s32.totalorder %v33_v57, 15  ;;  %vm644_vm8 = vcmp.eq.s32.totalorder %v47_v58, 0  ;;  %vm648_vm9 = vcmp.eq.s32.totalorder %v47_v58, 15 }
   0xa   :  { %202 = vrot.lane.b32.xlu0 %v569_v8, %s537_s14  ;;  %vm664_vm12 = vcmp.eq.s32.totalorder %v40_v62, 15  ;;  %vm688_vm15 = vcmp.eq.s32.totalorder %v40_v62, 0 }
   0xc   :  { %140 = vrot.lane.b32.xlu1 %v15_v4, %s538_s0 }
   0xe   :  { %462 = vrot.lane.b32.xlu0 %v574_v9, %s538_s0 }
  0x10   :  { %151 = vrot.lane.b32.xlu1 %v16_v2, %s539_s15 }
  0x12   :  { %467 = vrot.lane.b32.xlu0 %v456_v7, %s539_s15 }
  0x16   :  { %472 = vrot.lane.b32.xlu0 %v471_v10, %s537_s14 }
  0x76   :  { %v211_v11 = vpop.permute.xlu1 %210 }
  0x78   :  { %v453_v12 = vpop.permute.xlu0 %452 }
  0x79   :  { %v455_v14 = vunpack.i.h.bf16 %v453_v12  ;;  %v454_v15 = vunpack.i.l.bf16 %v453_v12 }
  0x7a   :  { %v458_v13 = vpop.permute.xlu1 %457 }
  0x7b   :  { %v460_v16 = vunpack.i.h.bf16 %v458_v13  ;;  %v459_v17 = vunpack.i.l.bf16 %v458_v13 }
  0x7c   :  { %v203_v18 = vpop.permute.xlu0 %202 }
  0x7d   :  { %v578_v19 = vsel %vm89_vm0, %v455_v14, %v203_v18  ;;  %v581_v20 = vsel %vm89_vm0, %v203_v18, %v454_v15  ;;  %v583_v21 = vsel %vm212_vm1, %v459_v17, %v460_v16  ;;  %v585_v22 = vsel %vm212_vm1, %v460_v16, %v211_v11 }
  0x7e   :  { %v481_v23 = vpack.i.bf16 %v583_v21, %v581_v20  ;;  %v141_v24 = vpop.permute.xlu1 %140  ;;  %v476_v25 = vpack.i.bf16 %v578_v19, %v585_v22  ;;  %v491_v27 = vpack.i.bf16 %v585_v22, %v583_v21  ;;  %v486_v30 = vpack.i.bf16 %v581_v20, %v578_v19 }
  0x7f   :  { %v289_v10 = vrot.slane %v578_v19, 4  ;;  %v290_v11 = vrot.slane %v581_v20, 4  ;;  %v291_v12 = vrot.slane %v583_v21, 4 }
  0x80   :  { %482 = vrot.lane.b32.xlu0 %v481_v23, %s540_s16  ;;  %v463_v26 = vpop.permute.xlu0 %462  ;;  %477 = vrot.lane.b32.xlu1 %v476_v25, %s540_s16 }
  0x81   :  { %v465_v28 = vunpack.i.h.bf16 %v463_v26  ;;  %v464_v29 = vunpack.i.l.bf16 %v463_v26 }
  0x82   :  { %v152_v32 = vpop.permute.xlu1 %151 }
  0x83   :  { %v599_v35 = vsel %vm142_vm2, %v465_v28, %v141_v24  ;;  %v605_v38 = vsel %vm142_vm2, %v464_v29, %v465_v28 }
  0x84   :  { %492 = vrot.lane.b32.xlu0 %v491_v27, %s541_s17  ;;  %v468_v31 = vpop.permute.xlu0 %467  ;;  %487 = vrot.lane.b32.xlu1 %v486_v30, %s541_s17  ;;  %v506_v45 = vpack.i.bf16 %v599_v35, %v605_v38 }
  0x85   :  { %v470_v33 = vunpack.i.h.bf16 %v468_v31  ;;  %v469_v34 = vunpack.i.l.bf16 %v468_v31 }
  0x87   :  { %v601_v36 = vsel %vm153_vm3, %v470_v33, %v152_v32  ;;  %v603_v37 = vsel %vm153_vm3, %v469_v34, %v470_v33 }
  0x88   :  { %v473_v39 = vpop.permute.xlu0 %472  ;;  %v501_v40 = vpack.i.bf16 %v603_v37, %v599_v35  ;;  %v496_v41 = vpack.i.bf16 %v605_v38, %v601_v36  ;;  %v511_v44 = vpack.i.bf16 %v601_v36, %v603_v37 }
  0x89   :  { %v475_v42 = vunpack.i.h.bf16 %v473_v39  ;;  %v474_v43 = vunpack.i.l.bf16 %v473_v39 }
  0x8a   :  { %502 = vrot.lane.b32.xlu0 %v501_v40, %s540_s16  ;;  %497 = vrot.lane.b32.xlu1 %v496_v41, %s540_s16 }
  0x8b   :  { %v618_v46 = vsel %vm89_vm0, %v454_v15, %v474_v43  ;;  %v621_v47 = vsel %vm89_vm0, %v474_v43, %v475_v42  ;;  %v292_v15 = vrot.slane %v585_v22, 4  ;;  %vm327_vm0 = vcmask 293888  }
  0x8c   :  { %v516_v48 = vpack.i.bf16 %v564_v3, %v621_v47  ;;  %v521_v49 = vpack.i.bf16 %v618_v46, %v569_v8  ;;  %v531_v50 = vpack.i.bf16 %v621_v47, %v618_v46  ;;  %v259_v56 = vrot.slane %v618_v46, 4 }
  0x8d   :  { %v260_v57 = vrot.slane %v621_v47, 4 }
  0x8e   :  { %512 = vrot.lane.b32.xlu0 %v511_v44, %s541_s17  ;;  %507 = vrot.lane.b32.xlu1 %v506_v45, %s541_s17 }
  0x92   :  { %522 = vrot.lane.b32.xlu0 %v521_v49, %s540_s16  ;;  %517 = vrot.lane.b32.xlu1 %v516_v48, %s540_s16 }
  0x96   :  { %532 = vrot.lane.b32.xlu0 %v531_v50, %s541_s17  ;;  %527 = vrot.lane.b32.xlu1 %v574_v9, %s541_s17 }
  0xf2   :  { %v483_v60 = vpop.permute.xlu0 %482  ;;  %v478_v61 = vpop.permute.xlu1 %477 }
  0xf3   :  { %v480_v4 = vunpack.i.h.bf16 %v478_v61  ;;  %v479_v5 = vunpack.i.l.bf16 %v478_v61  ;;  %v485_v6 = vunpack.i.h.bf16 %v483_v60  ;;  %v484_v7 = vunpack.i.l.bf16 %v483_v60 }
  0xf5   :  { %v224_v20 = vsel %vm101_vm4, %v480_v4, %v484_v7  ;;  %v226_v26 = vsel %vm101_vm4, %v485_v6, %v479_v5  ;;  %v225_v27 = vsel %vm101_vm4, %v484_v7, %v485_v6  ;;  %v231_v39 = vsel %vm101_vm4, %v479_v5, %v480_v4 }
  0xf6   :  { %v493_v13 = vpop.permute.xlu0 %492  ;;  %v488_v16 = vpop.permute.xlu1 %487 }
  0xf7   :  { %v495_v17 = vunpack.i.h.bf16 %v493_v13  ;;  %v494_v18 = vunpack.i.l.bf16 %v493_v13  ;;  %v490_v24 = vunpack.i.h.bf16 %v488_v16  ;;  %v489_v25 = vunpack.i.l.bf16 %v488_v16 }
  0xf9   :  { %v242_v28 = vsel %vm118_vm5, %v494_v18, %v495_v17  ;;  %v241_v22 = vsel %vm118_vm5, %v490_v24, %v494_v18  ;;  %v248_v29 = vsel %vm118_vm5, %v495_v17, %v489_v25  ;;  %v240_v30 = vsel %vm118_vm5, %v489_v25, %v490_v24 }
  0xfa   :  { %v255_v31 = vsel %vm664_vm12, %v225_v27, %v242_v28  ;;  %v250_v32 = vsel %vm636_vm6, %v241_v22, %v224_v20  ;;  %v254_v33 = vsel %vm640_vm7, %v224_v20, %v241_v22  ;;  %v256_v34 = vsel %vm648_vm9, %v226_v26, %v248_v29 }
  0xfb   :  { %v323_v42 = vpack.c.bf16 %v254_v33, %v254_v33  ;;  %v325_v43 = vpack.c.bf16 %v256_v34, %v256_v34  ;;  %v253_v44 = vsel %vm659_vm11, %v231_v39, %v240_v30  ;;  %v324_v45 = vpack.c.bf16 %v255_v31, %v255_v31 }
  0xfc   :  { %v503_v40 = vpop.permute.xlu0 %502  ;;  %v498_v41 = vpop.permute.xlu1 %497  ;;  %v252_v50 = vsel %vm644_vm8, %v248_v29, %v226_v26  ;;  %v322_v54 = vpack.c.bf16 %v253_v44, %v253_v44  ;;  %v698_v58 = vsel %vm297_vm14, %v250_v32, %v290_v11  ;;  %v249_v5 = vsel %vm652_vm10, %v240_v30, %v231_v39 }
  0xfd   :  { %v505_v48 = vunpack.i.h.bf16 %v503_v40  ;;  %v504_v49 = vunpack.i.l.bf16 %v503_v40  ;;  %v500_v52 = vunpack.i.h.bf16 %v498_v41  ;;  %v499_v53 = vunpack.i.l.bf16 %v498_v41  ;;  %440 = vmatprep.subr.msk.bf16.mxu0 %vm331_vm13, %v323_v42  ;;  %442 = vmatprep.subr.msk.bf16.mxu1 %vm331_vm13, %v325_v43 }
  0xfe   :  { %v339_v55 = vsel %vm331_vm13, %v324_v45, 0  ;;  %v333_v60 = vsel %vm331_vm13, %v322_v54, 0  ;;  %v703_v4 = vsel %vm297_vm14, %v252_v50, %v292_v15  ;;  %v251_v6 = vsel %vm688_vm15, %v242_v28, %v225_v27 }
  0xff   :  { %396 = vmatpush1.bf16.msra.mxu1 %v339_v55  ;;  %355 = vmatpush1.bf16.msra.mxu0 %v333_v60  ;;  %v168_v17 = vsel %vm101_vm4, %v504_v49, %v505_v48  ;;  %v167_v18 = vsel %vm101_vm4, %v500_v52, %v504_v49  ;;  %v169_v24 = vsel %vm101_vm4, %v505_v48, %v499_v53 }
 0x100   :  { %v513_v61 = vpop.permute.xlu0 %512  ;;  %v508_v62 = vpop.permute.xlu1 %507  ;;  %v174_v15 = vsel %vm101_vm4, %v499_v53, %v500_v52  ;;  %v310_v31 = vsel %vm297_vm14, %v249_v5, %v289_v10  ;;  %v312_v32 = vsel %vm297_vm14, %v251_v6, %v291_v12 }
 0x101   :  { %v515_v7 = vunpack.i.h.bf16 %v513_v61  ;;  %v514_v13 = vunpack.i.l.bf16 %v513_v61  ;;  %v510_v11 = vunpack.i.h.bf16 %v508_v62  ;;  %v509_v16 = vunpack.i.l.bf16 %v508_v62 }
 0x103   :  { %v185_v25 = vsel %vm118_vm5, %v514_v13, %v515_v7  ;;  %v184_v20 = vsel %vm118_vm5, %v510_v11, %v514_v13  ;;  %v183_v26 = vsel %vm118_vm5, %v509_v16, %v510_v11  ;;  %v191_v27 = vsel %vm118_vm5, %v515_v7, %v509_v16 }
 0x104   :  { %v198_v28 = vsel %vm664_vm12, %v168_v17, %v185_v25  ;;  %v193_v22 = vsel %vm636_vm6, %v184_v20, %v167_v18  ;;  %v523_v29 = vpop.permute.xlu0 %522  ;;  %v518_v30 = vpop.permute.xlu1 %517  ;;  %v194_v33 = vsel %vm688_vm15, %v185_v25, %v168_v17  ;;  %v192_v34 = vsel %vm652_vm10, %v183_v26, %v174_v15 }
 0x105   :  { %v195_v39 = vsel %vm644_vm8, %v191_v27, %v169_v24  ;;  %v196_v40 = vsel %vm659_vm11, %v174_v15, %v183_v26  ;;  %v283_v41 = vrot.slane %v198_v28, 4  ;;  %v197_v19 = vsel %vm640_vm7, %v167_v18, %v184_v20 }
 0x106   :  { %v199_v21 = vsel %vm648_vm9, %v169_v24, %v191_v27  ;;  %v270_v10 = vrot.slane %v193_v22, 4  ;;  %v272_v12 = vrot.slane %v195_v39, 4  ;;  %v281_v42 = vrot.slane %v196_v40, 4 }
 0x107   :  { %v282_v43 = vrot.slane %v197_v19, 4  ;;  %v284_v44 = vrot.slane %v199_v21, 4  ;;  %v525_v45 = vunpack.i.h.bf16 %v523_v29  ;;  %v524_v48 = vunpack.i.l.bf16 %v523_v29 }
 0x108   :  { %v520_v49 = vunpack.i.h.bf16 %v518_v30  ;;  %v519_v50 = vunpack.i.l.bf16 %v518_v30  ;;  %v533_v52 = vpop.permute.xlu0 %532  ;;  %v528_v53 = vpop.permute.xlu1 %527  ;;  %v306_v15 = vsel %vm297_vm14, %v605_v38, %v281_v42  ;;  %v308_v25 = vsel %vm297_vm14, %v603_v37, %v283_v41 }
 0x109   :  { %v535_v54 = vunpack.i.h.bf16 %v533_v52  ;;  %v534_v55 = vunpack.i.l.bf16 %v533_v52  ;;  %v530_v60 = vunpack.i.h.bf16 %v528_v53  ;;  %v529_v61 = vunpack.i.l.bf16 %v528_v53 }
 0x10a   :  { %v103_v62 = vsel %vm101_vm4, %v524_v48, %v525_v45  ;;  %v102_v5 = vsel %vm101_vm4, %v520_v49, %v524_v48  ;;  %v104_v6 = vsel %vm101_vm4, %v525_v45, %v519_v50  ;;  %v109_v7 = vsel %vm101_vm4, %v519_v50, %v520_v49 }
 0x10b   :  { %v121_v13 = vsel %vm118_vm5, %v534_v55, %v535_v54  ;;  %v120_v11 = vsel %vm118_vm5, %v530_v60, %v534_v55  ;;  %v119_v16 = vsel %vm118_vm5, %v529_v61, %v530_v60  ;;  %v127_v17 = vsel %vm118_vm5, %v535_v54, %v529_v61 }
 0x10c   :  { %v307_v18 = vsel %vm297_vm14, %v599_v35, %v282_v43  ;;  %v309_v24 = vsel %vm297_vm14, %v601_v36, %v284_v44  ;;  %v318_v27 = vpack.c.bf16 %v310_v31, %v306_v15  ;;  %v320_v28 = vpack.c.bf16 %v312_v32, %v308_v25 }
 0x10d   :  { %v319_v20 = vpack.c.bf16 %v698_v58, %v307_v18  ;;  %v321_v26 = vpack.c.bf16 %v703_v4, %v309_v24  ;;  %v129_v22 = vsel %vm636_vm6, %v120_v11, %v102_v5  ;;  %v133_v35 = vsel %vm640_vm7, %v102_v5, %v120_v11 }
 0x10e   :  { %v131_v36 = vsel %vm644_vm8, %v127_v17, %v104_v6  ;;  %v135_v38 = vsel %vm648_vm9, %v104_v6, %v127_v17  ;;  %v271_v29 = vrot.slane %v194_v33, 4  ;;  %v299_v37 = vsel %vm297_vm14, %v129_v22, %v569_v8 }
 0x10f   :  { %356 = vmatprep.subr.bf16.mxu0 %v319_v20  ;;  %397 = vmatprep.subr.bf16.mxu1 %v321_v26  ;;  %v303_v58 = vsel %vm297_vm14, %v133_v35, %v270_v10  ;;  %v301_v63 = vsel %vm297_vm14, %v131_v36, %v260_v57  ;;  %v269_v0 = vrot.slane %v192_v34, 4  ;;  %v305_v4 = vsel %vm297_vm14, %v135_v38, %v272_v12 }
 0x110   :  { %357 = vmatpush1.bf16.msra.mxu0 %v318_v27  ;;  %398 = vmatpush1.bf16.msra.mxu1 %v320_v28  ;;  %v315_v1 = vpack.c.bf16 %v303_v58, %v299_v37  ;;  %v128_v2 = vsel %vm652_vm10, %v119_v16, %v109_v7  ;;  %v317_v30 = vpack.c.bf16 %v305_v4, %v301_v63 }
 0x111   :  { %v132_v31 = vsel %vm659_vm11, %v109_v7, %v119_v16  ;;  %v298_v8 = vsel %vm297_vm14, %v128_v2, %v257_v59  ;;  %v130_v47 = vsel %vm688_vm15, %v121_v13, %v103_v62  ;;  %v134_v32 = vsel %vm664_vm12, %v103_v62, %v121_v13 }
 0x112   :  { %358 = vmatprep.subr.bf16.mxu0 %v315_v1  ;;  %v302_v57 = vsel %vm297_vm14, %v132_v31, %v269_v0  ;;  %v300_v9 = vsel %vm297_vm14, %v130_v47, %v259_v56  ;;  %399 = vmatprep.subr.bf16.mxu1 %v317_v30  ;;  %v304_v33 = vsel %vm297_vm14, %v134_v32, %v271_v29 }
 0x113   :  { %v314_v14 = vpack.c.bf16 %v302_v57, %v298_v8  ;;  %v316_v3 = vpack.c.bf16 %v304_v33, %v300_v9 }
 0x115   :  { %359 = vmatpush1.bf16.msra.mxu0 %v314_v14  ;;  %400 = vmatpush1.bf16.msra.mxu1 %v316_v3 }
 0x118   :  { %441 = vmatmul.mubr.msk.bf16.vlgmr.msra.gmra.mxu0 %vm327_vm0, %v326_v51  ;;  %443 = vmatmul.mubr.msk.bf16.vlgmr.msra.gmra.mxu1 %vm327_vm0, %v326_v51 }
 0x1d8   :  { %v378_v23 = vpop.f32.mrf.mxu0  ;;  %v419_v59 = vpop.f32.mrf.mxu1 }
 0x1da   :  { %v380_v34 = vpop.f32.mrf.mxu0  ;;  %v421_v39 = vpop.f32.mrf.mxu1 }
 0x1db   :  { %v430_v46 = vcombine.low %v378_v23, %v380_v34  ;;  %v431_v56 = vcombine.low %v419_v59, %v421_v39 }
 0x1dc   :  { %v382_v40 = vpop.f32.mrf.mxu0  ;;  %v423_v41 = vpop.f32.mrf.mxu1 }
 0x1dd   :  { %434 = vst [vmem:[%s799_s2] sm:$0xff] %v430_v46  ;;  %435 = vst [vmem:[%s799_s2 + $0x8] sm:$0xff] %v431_v56 }
 0x1de   :  { %v383_v19 = vpop.f32.mrf.mxu0  ;;  %v424_v21 = vpop.f32.mrf.mxu1 }

</bundles_post_ra>
